<compile_context>
chip_gen: v7x
topology: tpu7x:2x2x1
jax: 0.10.0
libtpu: 0.0.40
codegen_flags: <defaults>
</compile_context>

<pallas_src>
import functools
import math

import jax
import jax.numpy as jnp
from jax.experimental import pallas as pl
from jax.experimental.pallas import tpu as pltpu


# ---------------------------------------------------------------------------
# Kernel bodies
# ---------------------------------------------------------------------------

def _maxout_kernel_strided(x_ref, o_ref, *, pool, out_cols):
    # x_ref: (tm, Hc) input tile, Hc == out_cols * pool (whole groups only).
    # o_ref: (tm, out_cols) group maxima.
    # Unrolled max over `pool` lane-strided reads: no minor-dim-splitting
    # reshape, no accumulator scratch, everything stays lane-major.
    acc = x_ref[:, pl.ds(0, out_cols, stride=pool)]
    for k in range(1, pool):
        acc = jnp.maximum(acc, x_ref[:, pl.ds(k, out_cols, stride=pool)])
    o_ref[...] = acc.astype(o_ref.dtype)


def _maxout_kernel_reshape(x_ref, o_ref, *, pool):
    # Fallback: reshape (tm, Hc) -> (tm, Gc, pool) and reduce the minor dim.
    # This costs a relayout, so the wrapper keeps blocks small on this path.
    x = x_ref[...]
    o_ref[...] = jnp.max(x.reshape(o_ref.shape + (pool,)), axis=-1).astype(o_ref.dtype)


# ---------------------------------------------------------------------------
# Capability / hardware queries
# ---------------------------------------------------------------------------

@functools.lru_cache(maxsize=None)
def _lane_strided_reads_ok(dtype_name, pool):
    """One-time probe: do lane-strided VMEM reads lower AND give exact results?"""
    dtype = jnp.dtype(dtype_name)
    for rows, groups in ((16, 8), (64, 128)):
        cols = groups * pool
        try:
            x = jax.random.normal(
                jax.random.PRNGKey(0), (rows, cols), jnp.float32).astype(dtype)
            fn = pl.pallas_call(
                functools.partial(_maxout_kernel_strided, pool=pool, out_cols=groups),
                out_shape=jax.ShapeDtypeStruct((rows, groups), dtype),
            )
            got = jax.block_until_ready(fn(x))
            want = jnp.max(x.reshape(rows, groups, pool), axis=-1)
            if not bool(jnp.array_equal(got, want)):
                return False
        except Exception:
            return False
    return True


def _vmem_capacity_bytes():
    try:
        info = pltpu.get_tpu_info()
        cap = getattr(info, "vmem_capacity_bytes", None)
        if cap:
            return int(cap)
    except Exception:
        pass
    return 64 * 1024 * 1024  # conservative (v7x-class) default


def _round_up(a, b):
    return ((a + b - 1) // b) * b


# ---------------------------------------------------------------------------
# Wrapper
# ---------------------------------------------------------------------------

def maxout(x, pool_size):
    P = int(pool_size)
    H = x.shape[-1]
    assert H % P == 0, "Wrong input last dim size ({}) for Maxout({})".format(H, P)
    lead = x.shape[:-1]
    if P == 1:
        return x  # max over singleton groups is the identity
    G = H // P
    M = math.prod(lead)

    x2 = x.reshape(M, H)  # free reshape, no extra HBM pass

    itemsize = jnp.dtype(x.dtype).itemsize
    # Sublane packing: 8 rows for 4-byte dtypes, 16 for bf16, 32 for int8/fp8.
    sublane = {4: 8, 2: 16, 1: 32}.get(itemsize, 8)
    vmem_cap = _vmem_capacity_bytes()

    def run(strided):
        # ---- per-generation input-block byte budget ------------------------
        if vmem_cap >= 96 * 1024 * 1024:    # v5e / v6e class (128 MiB VMEM)
            budget = 8 * 1024 * 1024
        else:                               # v7x class (64 MiB VMEM, ~3.2 TB/s HBM)
            budget = 10 * 1024 * 1024
        if not strided:
            # The reshape fallback materialises a lane-padded (tm, Gc, P)
            # intermediate (~128/P x the block bytes): keep blocks small.
            budget = min(budget, max(128 * 1024, P * 64 * 1024))

        # ---- column (group) tiling for very large H ------------------------
        if H * itemsize * sublane > budget:
            unit = 128 * P                  # lane-aligned input & output blocks
            Hc = max(unit, (budget // (sublane * itemsize)) // unit * unit)
            if Hc >= H:
                Hc = H
        else:
            Hc = H
        Gc = Hc // P
        n_col = pl.cdiv(H, Hc)

        # ---- row tiling: bytes (no fixed row cap) drive the tile -----------
        rows_budget = max(sublane, (budget // (Hc * itemsize)) // sublane * sublane)
        tm = min(rows_budget, M)
        if tm < M:
            tm = max(sublane, (tm // sublane) * sublane)
        n_row = pl.cdiv(M, tm)

        # ---- ensure enough parallel grid steps (v7x has 2 TensorCores) -----
        if n_row * n_col < 8 and M > sublane:
            for steps, floor_bytes in ((8, 1 << 20), (4, 1 << 20), (2, 512 << 10)):
                rb = max(1, steps // n_col)
                cand = _round_up(pl.cdiv(M, rb), sublane)
                if cand < tm and cand * Hc * itemsize >= floor_bytes:
                    tm = cand
                    break
            n_row = pl.cdiv(M, tm)

        in_bytes = tm * Hc * itemsize
        out_bytes = tm * Gc * itemsize
        vmem_limit = int(min(max(2 * (in_bytes + out_bytes) + (2 << 20), 32 << 20),
                             (vmem_cap * 3) // 4))

        if strided:
            kernel = functools.partial(_maxout_kernel_strided, pool=P, out_cols=Gc)
        else:
            kernel = functools.partial(_maxout_kernel_reshape, pool=P)

        return pl.pallas_call(
            kernel,
            out_shape=jax.ShapeDtypeStruct((M, G), x.dtype),
            grid=(n_row, n_col),
            in_specs=[pl.BlockSpec((tm, Hc), lambda i, j: (i, j))],
            out_specs=pl.BlockSpec((tm, Gc), lambda i, j: (i, j)),
            compiler_params=pltpu.CompilerParams(
                dimension_semantics=("parallel", "parallel"),
                vmem_limit_bytes=vmem_limit,
            ),
        )(x2)

    if _lane_strided_reads_ok(jnp.dtype(x.dtype).name, P):
        try:
            return jax.block_until_ready(run(True)).reshape(*lead, G)
        except Exception:
            pass  # unexpected geometry-specific failure -> safe fallback
    return run(False).reshape(*lead, G)


# ---------------------------------------------------------------------------
# Self-test
# ---------------------------------------------------------------------------

if __name__ == "__main__":
    # Maxout has no learnable parameters; only pool_size.
    pool_size = 4
    key = jax.random.PRNGKey(0)
    x = jax.random.normal(key, (2, 8, 32), dtype=jnp.float32)
    y = jax.block_until_ready(maxout(x, pool_size))
    y_ref = jnp.max(x.reshape(2, 8, 8, 4), axis=-1)
    assert y.shape == y_ref.shape == (2, 8, 8)
    assert y.dtype == x.dtype
    assert jnp.array_equal(y, y_ref)

    # Non-power-of-two pool size.
    x2 = jax.random.normal(jax.random.PRNGKey(1), (5, 4, 24), dtype=jnp.float32)
    y2 = jax.block_until_ready(maxout(x2, 3))
    assert jnp.array_equal(y2, jnp.max(x2.reshape(5, 4, 8, 3), axis=-1))

    # Moderate shape that exercises the multi-block parallel grid.
    x3 = jax.random.normal(jax.random.PRNGKey(2), (4, 128, 512), dtype=jnp.float32)
    y3 = jax.block_until_ready(maxout(x3, pool_size))
    assert jnp.array_equal(y3, jnp.max(x3.reshape(4, 128, 128, 4), axis=-1))

    # bf16 path (dtype-dependent sublane packing).
    x4 = jax.random.normal(jax.random.PRNGKey(3), (2, 8, 64), dtype=jnp.bfloat16)
    y4 = jax.block_until_ready(maxout(x4, 2))
    assert jnp.array_equal(y4, jnp.max(x4.reshape(2, 8, 32, 2), axis=-1))

    print("KERNEL_OK")
</pallas_src>

<mosaic_0001>
module attributes {stable_mosaic.version = 11 : i64} {
  func.func @_maxout_kernel_strided(%arg0: memref<16x32xf32, #tpu.memory_space<vmem>>, %arg1: memref<16x8xf32, #tpu.memory_space<vmem>>) attributes {dimension_semantics = [], scalar_prefetch = 0 : i64, scratch_operands = 0 : i64, tpu.core_type = #tpu.core_type<tc>} {
    %c0 = arith.constant 0 : index
    %c0_0 = arith.constant 0 : index
    %0 = tpu.strided_load %arg0[%c0, %c0_0] {strides = array<i32: 1, 4>} : memref<16x32xf32, #tpu.memory_space<vmem>>, vector<16x8xf32>
    %c0_1 = arith.constant 0 : index
    %c1 = arith.constant 1 : index
    %1 = tpu.strided_load %arg0[%c0_1, %c1] {strides = array<i32: 1, 4>} : memref<16x32xf32, #tpu.memory_space<vmem>>, vector<16x8xf32>
    %2 = arith.maximumf %0, %1 : vector<16x8xf32>
    %c0_2 = arith.constant 0 : index
    %c2 = arith.constant 2 : index
    %3 = tpu.strided_load %arg0[%c0_2, %c2] {strides = array<i32: 1, 4>} : memref<16x32xf32, #tpu.memory_space<vmem>>, vector<16x8xf32>
    %4 = arith.maximumf %2, %3 : vector<16x8xf32>
    %c0_3 = arith.constant 0 : index
    %c3 = arith.constant 3 : index
    %5 = tpu.strided_load %arg0[%c0_3, %c3] {strides = array<i32: 1, 4>} : memref<16x32xf32, #tpu.memory_space<vmem>>, vector<16x8xf32>
    %6 = arith.maximumf %4, %5 : vector<16x8xf32>
    %c0_4 = arith.constant 0 : index
    %c0_5 = arith.constant 0 : index
    %7 = vector.load %arg1[%c0_4, %c0_5] : memref<16x8xf32, #tpu.memory_space<vmem>>, vector<16x8xf32>
    tpu.vector_store %arg1[%c0_4, %c0_5], %6 {strides = array<i32>} : memref<16x8xf32, #tpu.memory_space<vmem>>, vector<16x8xf32>,
    return
  }
}

module attributes {stable_mosaic.version = 11 : i64} {
  func.func @_maxout_kernel_reshape(%arg0: i32, %arg1: i32, %arg2: memref<16x32xf32, #tpu.memory_space<vmem>>, %arg3: memref<16x8xf32, #tpu.memory_space<vmem>>) attributes {dimension_semantics = [#tpu.dimension_semantics<parallel>, #tpu.dimension_semantics<parallel>], iteration_bounds = array<i64: 1, 1>, scalar_prefetch = 0 : i64, scratch_operands = 0 : i64, tpu.core_type = #tpu.core_type<tc>, window_params = [{transform_indices = @transform_0, window_bounds = array<i64: 16, 32>}, {transform_indices = @transform_1, window_bounds = array<i64: 16, 8>}]} {
    %c0 = arith.constant 0 : index
    %c0_0 = arith.constant 0 : index
    %0 = vector.load %arg2[%c0, %c0_0] : memref<16x32xf32, #tpu.memory_space<vmem>>, vector<16x32xf32>
    %1 = vector.shape_cast %0 : vector<16x32xf32> to vector<16x8x4xf32>
    %cst = arith.constant dense<0xFF800000> : vector<16x8xf32>
    %2 = vector.multi_reduction <maximumf>, %1, %cst [2] : vector<16x8x4xf32> to vector<16x8xf32>
    %c0_1 = arith.constant 0 : index
    %c0_2 = arith.constant 0 : index
    %3 = vector.load %arg3[%c0_1, %c0_2] : memref<16x8xf32, #tpu.memory_space<vmem>>, vector<16x8xf32>
    tpu.vector_store %arg3[%c0_1, %c0_2], %2 {strides = array<i32>} : memref<16x8xf32, #tpu.memory_space<vmem>>, vector<16x8xf32>,
    return
  }
  func.func @transform_0(%arg0: i32, %arg1: i32) -> (i32, i32) {
    %c0_i32 = arith.constant 0 : i32
    return %arg0, %arg1 : i32, i32
  }
  func.func @transform_1(%arg0: i32, %arg1: i32) -> (i32, i32) {
    %c0_i32 = arith.constant 0 : i32
    return %arg0, %arg1 : i32, i32
  }
}

</mosaic_0001>

<bundles_post_ra>
// kernel: tpu_custom_call.1
= control target key start
LH: loop header
LB: loop body
LE: loop exit
PB: predicated region body
PF: predicated region fallthrough
CT: control target
= control target key end

     0   :  { %6 = vsyncpa [#allocation3], 0  ;;  %s538_s6 = smov [#allocation2]   ;;  %s710_s0 = inlined_call_operand.hbm [shape: f32[16,32], index: 0, kind: input, shape index: {}]   ;;  %s711_s1 = inlined_call_operand.vmem [shape: f32[16,8], index: 1, kind: output, shape index: {}]  }
   0x1   :  { %s12_s7 = sshll.u32 %s538_s6, 4  ;;  %s514_s10 = scalar_lea.hbm %s710_s0, 256  ;;  %s13_s7 = int_to_ptr.vmem [resolvable:$true] %s12_s7 }
   0x2   :  { %p515_p0 = scmp.ne.s32.totalorder %s710_s0, %s514_s10  ;;  %p518_p1 = scmp.lt.u32.totalorder %s514_s10, %s710_s0 }
   0x4   :  { %p520_p2 = pnand %p518_p1, %p515_p0 }
   0x6   :  { %523 = shalt.err (!%p520_p2)
}
   0x7   :  { %s524_s15 = scalar_lea.vmem %s13_s7, 256  ;;  %p529_p4 = scmp.lt.s32.totalorder %s13_s7, %s13_s7 }
   0x8   :  { %p525_p3 = scmp.ne.s32.totalorder %s13_s7, %s524_s15  ;;  %p530_p5 = scmp.lt.s32.totalorder %s524_s15, %s524_s15 }
   0xa   :  { %p531_p6 = por %p530_p5, %p529_p4 }
   0xc   :  { %p532_p7 = pnand %p531_p6, %p525_p3 }
   0xe   :  { %535 = shalt.err (!%p532_p7)
}
   0xf   :  { %s539_s16 = smov 128   ;;  %s540_s17 = smov 8  }
  0x10   :  { %18 = dma.hbm_to_vmem [thread:$0]  %s710_s0, 256, %s13_s7, [#allocation3], %s539_s16, %s539_s16, %s540_s17  }
  0x11   :  { %536 = dma.done.wait [#allocation3], 256  }
  0x12   :  { %537 = vsyncadd [#allocation3], 4294967040  ;;  %v572_v0 = vld [vmem:[#allocation2] sm:$0xff]  ;;  %s541_s20 = smov 120   ;;  %s542_s21 = smov 124   ;;  %v576_v1 = vld [vmem:[#allocation2 + $0x8] sm:$0xff]  ;;  %v73_v2 = vlaneseq }
  0x13   :  { %32 = vrot.lane.b32.xlu1 %v572_v0, %s541_s20  ;;  %26 = vrot.lane.b32.xlu0 %v572_v0, %s542_s21  ;;  %s543_s22 = smov 116   ;;  %s544_s0 = smov 112   ;;  %v548_v14 = vmov 1983009808   ;;  %v549_v22 = vmov 1934713408  }
  0x14   :  { %s545_s23 = smov 108   ;;  %s546_s24 = smov 104   ;;  %v74_v3 = vshrl.u32 %v73_v2, 7  ;;  %v406_v4 = vand.u32 127, %v73_v2  ;;  %v71_v15 = vunpack.c.l.s4 %v548_v14  ;;  %v135_v23 = vunpack.c.l.s4 %v549_v22 }
  0x15   :  { %s547_s25 = smov 100   ;;  %vm340_vm0 = vcmask 31744   ;;  %vm471_vm1 = vcmask 1041409   ;;  %vm473_vm2 = vcmask 1042434   ;;  %vm475_vm3 = vcmask 1043459  }
  0x16   :  { %v590_v5 = vsub.s32 %v406_v4, %v74_v3  ;;  %v72_v18 = vunpack.c.0.s8 %v71_v15  ;;  %v136_v33 = vunpack.c.0.s8 %v135_v23  ;;  %vm477_vm4 = vcmask 1044484  }
  0x17   :  { %34 = vrot.lane.b32.xlu1 %v576_v1, %s541_s20  ;;  %28 = vrot.lane.b32.xlu0 %v576_v1, %s542_s21  ;;  %vm479_vm5 = vcmask 1045509   ;;  %vm481_vm6 = vcmask 1046534   ;;  %vm483_vm7 = vcmask 1047559   ;;  %vm494_vm8 = vcmask 64512  }
  0x18   :  { %v604_v24 = vsub.s32 %v72_v18, %v74_v3  ;;  %v622_v45 = vsub.s32 %v136_v33, %v74_v3 }
  0x1b   :  { %40 = vrot.lane.b32.xlu1 %v576_v1, %s543_s22  ;;  %38 = vrot.lane.b32.xlu0 %v572_v0, %s543_s22 }
  0x1f   :  { %46 = vrot.lane.b32.xlu1 %v576_v1, %s544_s0  ;;  %44 = vrot.lane.b32.xlu0 %v572_v0, %s544_s0 }
  0x23   :  { %52 = vrot.lane.b32.xlu1 %v576_v1, %s545_s23  ;;  %50 = vrot.lane.b32.xlu0 %v572_v0, %s545_s23 }
  0x27   :  { %58 = vrot.lane.b32.xlu1 %v576_v1, %s546_s24  ;;  %56 = vrot.lane.b32.xlu0 %v572_v0, %s546_s24 }
  0x2b   :  { %64 = vrot.lane.b32.xlu1 %v576_v1, %s547_s25  ;;  %62 = vrot.lane.b32.xlu0 %v572_v0, %s547_s25 }
  0x85   :  { %v33_v6 = vpop.permute.xlu1 %32  ;;  %v27_v7 = vpop.permute.xlu0 %26 }
  0x86   :  { %v68_v25 = vcombine.low %v572_v0, %v33_v6  ;;  %v69_v53 = vcombine.high %v572_v0, %v33_v6 }
  0x88   :  { %v76_v36 = vrot.slane %v68_v25, %v604_v24  ;;  %v83_v2 = vrot.slane %v69_v53, %v604_v24 }
  0x89   :  { %v592_v8 = vpop.permute.xlu1 %34  ;;  %v594_v9 = vpop.permute.xlu0 %28 }
  0x8a   :  { %v204_v26 = vcombine.low %v576_v1, %v592_v8 }
  0x8c   :  { %v212_v37 = vrot.slane %v204_v26, %v604_v24 }
  0x8d   :  { %v596_v10 = vpop.permute.xlu1 %40  ;;  %v39_v11 = vpop.permute.xlu0 %38 }
  0x8e   :  { %v84_v19 = vcombine.low %v27_v7, %v39_v11  ;;  %v220_v27 = vcombine.low %v594_v9, %v596_v10  ;;  %v85_v46 = vcombine.high %v27_v7, %v39_v11  ;;  %v221_v18 = vcombine.high %v594_v9, %v596_v10 }
  0x90   :  { %v92_v29 = vrot.slane %v84_v19, %v604_v24  ;;  %v228_v38 = vrot.slane %v220_v27, %v604_v24  ;;  %v99_v59 = vrot.slane %v85_v46, %v604_v24 }
  0x91   :  { %v598_v12 = vpop.permute.xlu1 %46  ;;  %v45_v13 = vpop.permute.xlu0 %44 }
  0x92   :  { %v132_v43 = vcombine.low %v76_v36, %v92_v29  ;;  %v268_v49 = vcombine.low %v212_v37, %v228_v38  ;;  %v133_v50 = vcombine.high %v76_v36, %v92_v29  ;;  %v148_v19 = vcombine.low %v83_v2, %v99_v59 }
  0x94   :  { %v140_v55 = vrot.slane %v132_v43, %v622_v45  ;;  %v147_v63 = vrot.slane %v133_v50, %v622_v45  ;;  %v276_v0 = vrot.slane %v268_v49, %v622_v45  ;;  %v156_v9 = vrot.slane %v148_v19, %v622_v45 }
  0x95   :  { %v600_v16 = vpop.permute.xlu1 %52  ;;  %v51_v17 = vpop.permute.xlu0 %50 }
  0x99   :  { %v602_v20 = vpop.permute.xlu1 %58  ;;  %v57_v21 = vpop.permute.xlu0 %56 }
  0x9a   :  { %v236_v28 = vcombine.low %v598_v12, %v602_v20  ;;  %v100_v30 = vcombine.low %v45_v13, %v57_v21  ;;  %v101_v47 = vcombine.high %v45_v13, %v57_v21  ;;  %v237_v15 = vcombine.high %v598_v12, %v602_v20 }
  0x9c   :  { %v244_v39 = vrot.slane %v236_v28, %v604_v24  ;;  %v108_v44 = vrot.slane %v100_v30, %v604_v24  ;;  %v115_v60 = vrot.slane %v101_v47, %v604_v24  ;;  %v251_v27 = vrot.slane %v237_v15, %v604_v24 }
  0x9d   :  { %v65_v31 = vpop.permute.xlu1 %64  ;;  %v63_v32 = vpop.permute.xlu0 %62 }
  0x9e   :  { %v252_v34 = vcombine.low %v600_v16, %v65_v31  ;;  %v116_v35 = vcombine.low %v51_v17, %v63_v32  ;;  %v117_v41 = vcombine.high %v51_v17, %v63_v32  ;;  %v253_v3 = vcombine.high %v600_v16, %v65_v31 }
  0x9f   :  { %v205_v17 = vcombine.high %v576_v1, %v592_v8  ;;  %v269_v16 = vcombine.high %v212_v37, %v228_v38  ;;  %v235_v8 = vrot.slane %v221_v18, %v604_v24 }
  0xa0   :  { %v260_v40 = vrot.slane %v252_v34, %v604_v24  ;;  %v124_v42 = vrot.slane %v116_v35, %v604_v24  ;;  %v131_v54 = vrot.slane %v117_v41, %v604_v24  ;;  %v267_v21 = vrot.slane %v253_v3, %v604_v24 }
  0xa1   :  { %v219_v1 = vrot.slane %v205_v17, %v604_v24  ;;  %v283_v10 = vrot.slane %v269_v16, %v622_v45  ;;  %v149_v35 = vcombine.high %v83_v2, %v99_v59 }
  0xa2   :  { %v300_v48 = vcombine.low %v244_v39, %v260_v40  ;;  %v164_v51 = vcombine.low %v108_v44, %v124_v42  ;;  %v165_v52 = vcombine.high %v108_v44, %v124_v42  ;;  %v301_v4 = vcombine.high %v244_v39, %v260_v40 }
  0xa3   :  { %v180_v6 = vcombine.low %v115_v60, %v131_v54  ;;  %v316_v28 = vcombine.low %v251_v27, %v267_v21  ;;  %v181_v29 = vcombine.high %v115_v60, %v131_v54  ;;  %v284_v34 = vcombine.low %v219_v1, %v235_v8 }
  0xa4   :  { %v172_v56 = vrot.slane %v164_v51, %v622_v45  ;;  %v179_v57 = vrot.slane %v165_v52, %v622_v45  ;;  %v308_v58 = vrot.slane %v300_v48, %v622_v45  ;;  %v315_v23 = vrot.slane %v301_v4, %v622_v45 }
  0xa5   :  { %v188_v22 = vrot.slane %v180_v6, %v622_v45  ;;  %v195_v36 = vrot.slane %v181_v29, %v622_v45  ;;  %v324_v24 = vrot.slane %v316_v28, %v622_v45  ;;  %v163_v41 = vrot.slane %v149_v35, %v622_v45 }
  0xa6   :  { %v197_v61 = vcombine.high %v140_v55, %v172_v56  ;;  %v196_v62 = vcombine.low %v140_v55, %v172_v56  ;;  %v198_v13 = vcombine.low %v147_v63, %v179_v57  ;;  %v332_v14 = vcombine.low %v276_v0, %v308_v58 }
  0xa7   :  { %v199_v20 = vcombine.high %v147_v63, %v179_v57  ;;  %v333_v26 = vcombine.high %v276_v0, %v308_v58  ;;  %v200_v32 = vcombine.low %v156_v9, %v188_v22  ;;  %v334_v33 = vcombine.low %v283_v10, %v315_v23 }
  0xa8   :  { %v344_v7 = vsel %vm340_vm0, %v197_v61, -inf  ;;  %v341_v11 = vsel %vm340_vm0, %v196_v62, -inf  ;;  %v347_v25 = vsel %vm340_vm0, %v198_v13, -inf  ;;  %v365_v12 = vsel %vm340_vm0, %v332_v14, -inf }
  0xa9   :  { %345 = vmax.xlane.f32.xlu1 %v344_v7  ;;  %342 = vmax.xlane.f32.xlu0 %v341_v11  ;;  %v350_v30 = vsel %vm340_vm0, %v199_v20, -inf  ;;  %v368_v31 = vsel %vm340_vm0, %v333_v26, -inf  ;;  %v353_v37 = vsel %vm340_vm0, %v200_v32, -inf  ;;  %v371_v38 = vsel %vm340_vm0, %v334_v33, -inf }
  0xaa   :  { %v201_v39 = vcombine.high %v156_v9, %v188_v22  ;;  %v335_v40 = vcombine.high %v283_v10, %v315_v23  ;;  %v292_v42 = vrot.slane %v284_v34, %v622_v45  ;;  %v317_v43 = vcombine.high %v251_v27, %v267_v21 }
  0xab   :  { %v202_v47 = vcombine.low %v163_v41, %v195_v36  ;;  %v285_v49 = vcombine.high %v219_v1, %v235_v8  ;;  %v203_v53 = vcombine.high %v163_v41, %v195_v36 }
  0xac   :  { %v356_v44 = vsel %vm340_vm0, %v201_v39, -inf  ;;  %v374_v46 = vsel %vm340_vm0, %v335_v40, -inf  ;;  %v336_v48 = vcombine.low %v292_v42, %v324_v24  ;;  %v331_v50 = vrot.slane %v317_v43, %v622_v45 }
  0xad   :  { %348 = vmax.xlane.f32.xlu1 %v347_v25  ;;  %366 = vmax.xlane.f32.xlu0 %v365_v12  ;;  %v359_v51 = vsel %vm340_vm0, %v202_v47, -inf  ;;  %v337_v54 = vcombine.high %v292_v42, %v324_v24  ;;  %v299_v55 = vrot.slane %v285_v49, %v622_v45  ;;  %v362_v56 = vsel %vm340_vm0, %v203_v53, -inf }
  0xae   :  { %v377_v52 = vsel %vm340_vm0, %v336_v48, -inf }
  0xaf   :  { %v380_v57 = vsel %vm340_vm0, %v337_v54, -inf  ;;  %v338_v58 = vcombine.low %v299_v55, %v331_v50  ;;  %v339_v60 = vcombine.high %v299_v55, %v331_v50 }
  0xb1   :  { %351 = vmax.xlane.f32.xlu1 %v350_v30  ;;  %369 = vmax.xlane.f32.xlu0 %v368_v31  ;;  %v383_v59 = vsel %vm340_vm0, %v338_v58, -inf  ;;  %v386_v61 = vsel %vm340_vm0, %v339_v60, -inf }
  0xb5   :  { %354 = vmax.xlane.f32.xlu1 %v353_v37  ;;  %372 = vmax.xlane.f32.xlu0 %v371_v38 }
  0xb9   :  { %357 = vmax.xlane.f32.xlu1 %v356_v44  ;;  %375 = vmax.xlane.f32.xlu0 %v374_v46 }
  0xbd   :  { %360 = vmax.xlane.f32.xlu1 %v359_v51  ;;  %378 = vmax.xlane.f32.xlu0 %v377_v52 }
  0xc1   :  { %363 = vmax.xlane.f32.xlu1 %v362_v56  ;;  %381 = vmax.xlane.f32.xlu0 %v380_v57 }
  0xc5   :  { %384 = vmax.xlane.f32.xlu0 %v383_v59 }
  0xc9   :  { %387 = vmax.xlane.f32.xlu0 %v386_v61 }
 0x136   :  { %v346_v62 = vpop.xlane.xlu1 %345  ;;  %v343_v63 = vpop.xlane.xlu0 %342 }
 0x137   :  { %v414_v13 = vrot.slane %v346_v62, %v590_v5  ;;  %v410_v14 = vrot.slane %v343_v63, %v590_v5 }
 0x139   :  { %v472_v21 = vsel %vm471_vm1, %v414_v13, %v410_v14 }
 0x13a   :  { %v349_v0 = vpop.xlane.xlu1 %348  ;;  %v367_v2 = vpop.xlane.xlu0 %366 }
 0x13b   :  { %v418_v15 = vrot.slane %v349_v0, %v590_v5  ;;  %v442_v29 = vrot.slane %v367_v2, %v590_v5 }
 0x13d   :  { %v474_v23 = vsel %vm473_vm2, %v418_v15, %v472_v21 }
 0x13e   :  { %v352_v3 = vpop.xlane.xlu1 %351  ;;  %v370_v45 = vpop.xlane.xlu0 %369 }
 0x13f   :  { %v422_v17 = vrot.slane %v352_v3, %v590_v5  ;;  %v446_v1 = vrot.slane %v370_v45, %v590_v5 }
 0x141   :  { %v476_v12 = vsel %vm475_vm3, %v422_v17, %v474_v23  ;;  %v485_v34 = vsel %vm471_vm1, %v446_v1, %v442_v29 }
 0x142   :  { %v355_v4 = vpop.xlane.xlu1 %354  ;;  %v373_v6 = vpop.xlane.xlu0 %372 }
 0x143   :  { %v426_v18 = vrot.slane %v355_v4, %v590_v5  ;;  %v450_v10 = vrot.slane %v373_v6, %v590_v5 }
 0x145   :  { %v478_v20 = vsel %vm477_vm4, %v426_v18, %v476_v12  ;;  %v486_v36 = vsel %vm473_vm2, %v450_v10, %v485_v34 }
 0x146   :  { %v358_v7 = vpop.xlane.xlu1 %357  ;;  %v376_v11 = vpop.xlane.xlu0 %375 }
 0x147   :  { %v430_v22 = vrot.slane %v358_v7, %v590_v5  ;;  %v454_v30 = vrot.slane %v376_v11, %v590_v5 }
 0x149   :  { %v480_v8 = vsel %vm479_vm5, %v430_v22, %v478_v20  ;;  %v487_v37 = vsel %vm475_vm3, %v454_v30, %v486_v36 }
 0x14a   :  { %v361_v16 = vpop.xlane.xlu1 %360  ;;  %v379_v19 = vpop.xlane.xlu0 %378 }
 0x14b   :  { %v434_v25 = vrot.slane %v361_v16, %v590_v5  ;;  %v458_v32 = vrot.slane %v379_v19, %v590_v5 }
 0x14d   :  { %v482_v28 = vsel %vm481_vm6, %v434_v25, %v480_v8  ;;  %v488_v38 = vsel %vm477_vm4, %v458_v32, %v487_v37 }
 0x14e   :  { %v364_v26 = vpop.xlane.xlu1 %363  ;;  %v382_v27 = vpop.xlane.xlu0 %381 }
 0x14f   :  { %v438_v9 = vrot.slane %v364_v26, %v590_v5  ;;  %v462_v35 = vrot.slane %v382_v27, %v590_v5 }
 0x151   :  { %v484_v31 = vsel %vm483_vm7, %v438_v9, %v482_v28  ;;  %v489_v40 = vsel %vm479_vm5, %v462_v35, %v488_v38 }
 0x152   :  { %495 = vst.msk [vmem:[%s711_s1] sm:$0xff] %vm494_vm8, %v484_v31  ;;  %v385_v33 = vpop.xlane.xlu0 %384 }
 0x153   :  { %v466_v24 = vrot.slane %v385_v33, %v590_v5 }
 0x155   :  { %v490_v42 = vsel %vm481_vm6, %v466_v24, %v489_v40 }
 0x156   :  { %v388_v39 = vpop.xlane.xlu0 %387 }
 0x157   :  { %v470_v41 = vrot.slane %v388_v39, %v590_v5 }
 0x159   :  { %v491_v43 = vsel %vm483_vm7, %v470_v41, %v490_v42 }
 0x15a   :  { %496 = vst.msk [vmem:[%s711_s1 + $0x8] sm:$0xff] %vm494_vm8, %v491_v43 }
 0x15b   :  { %501 = vsyncpa [#allocation3], 1 }

</bundles_post_ra>
